<compile_context>
chip_gen: v7x
topology: tpu7x:2x2x1
jax: 0.10.0
libtpu: 0.0.40
codegen_flags: <defaults>
</compile_context>

<pallas_src>
import jax
import jax.numpy as jnp
from jax.experimental import pallas as pl
from jax.experimental.pallas import tpu as pltpu


def _cluster_assign_kernel(c_ref, x_ref, out_ref):
    """Nearest-center assignment for one lane-dense tile of samples.

    c_ref:   (K, D)      float32 micro-cluster centers (resident across tiles)
    x_ref:   (D, TILE_N) float32 transposed sample tile (streamed)
    out_ref: (1, TILE_N) int32 argmin cluster index per sample (lane-dense)
    """
    c = c_ref[...]                                               # (K, D)
    x = x_ref[...]                                               # (D, TILE_N)

    # argmin_k ||x - c_k||^2 == argmin_k (||c_k||^2 - 2 x.c_k)   (||x||^2 dropped)
    csq = jnp.sum(c * c, axis=-1, keepdims=True)                 # (K, 1), tiny
    scores = jnp.dot(c, x, preferred_element_type=jnp.float32)   # (K, TILE_N) on MXU
    d2 = csq - 2.0 * scores                                      # (K, TILE_N)

    k_dim = d2.shape[0]
    best_val = d2[0:1, :]                                        # (1, TILE_N)
    best_idx = jnp.zeros_like(best_val, dtype=jnp.int32)         # (1, TILE_N)
    # Unrolled VPU running-min/argmin over the (small, static) K axis.
    # Strict '<' keeps the earliest index on ties (matches jnp.argmin).
    for kk in range(1, k_dim):
        cand = d2[kk:kk + 1, :]
        better = cand < best_val
        best_val = jnp.where(better, cand, best_val)
        best_idx = jnp.where(better, jnp.int32(kk), best_idx)

    out_ref[...] = best_idx


def cluster_net_forward(x: jax.Array, centers: jax.Array, *, tile_n: int = 2048) -> jax.Array:
    """Pallas-backed ClusterNet.forward: per-sample nearest cluster id.

    Args:
        x:       (N, D) samples.
        centers: (K, D) micro-cluster centers.
        tile_n:  samples per grid step (clipped to the padded N if smaller).

    Returns:
        (N,) int32 cluster assignments.
    """
    n, d = x.shape
    k, d2 = centers.shape
    assert d == d2, "feature dims must match"

    x = x.astype(jnp.float32)
    centers = centers.astype(jnp.float32)

    # Lane-dense tiling: TILE_N must be a multiple of 128; pad N up to a multiple.
    n_pad_min = ((n + 127) // 128) * 128
    tile_n = min(tile_n, n_pad_min)
    tile_n = ((tile_n + 127) // 128) * 128
    n_pad = ((n + tile_n - 1) // tile_n) * tile_n
    num_tiles = n_pad // tile_n

    # Layout plumbing in the wrapper: transpose + zero-pad the sample axis so the
    # kernel sees a lane-dense (D, TILE_N) slab per step.
    x_t = jnp.pad(x.T, ((0, 0), (0, n_pad - n)))                 # (D, N_pad)

    out = pl.pallas_call(
        _cluster_assign_kernel,
        out_shape=jax.ShapeDtypeStruct((1, n_pad), jnp.int32),
        grid_spec=pl.GridSpec(
            grid=(num_tiles,),
            in_specs=[
                pl.BlockSpec((k, d), lambda i: (0, 0)),          # centers: resident
                pl.BlockSpec((d, tile_n), lambda i: (0, i)),     # x tile: streamed
            ],
            out_specs=pl.BlockSpec((1, tile_n), lambda i: (0, i)),
        ),
        compiler_params=pltpu.CompilerParams(
            dimension_semantics=("parallel",),
        ),
        cost_estimate=pl.CostEstimate(
            flops=2 * n * k * d,
            transcendentals=0,
            bytes_accessed=4 * (n * d + k * d + n),
        ),
    )(centers, x_t)

    return out[0, :n]


def _reference_forward(x, centers):
    d2 = (
        jnp.sum(x * x, axis=-1, keepdims=True)
        - 2.0 * (x @ centers.T)
        + jnp.sum(centers * centers, axis=-1)[None, :]
    )
    return jnp.argmin(d2, axis=-1).astype(jnp.int32)


if __name__ == "__main__":
    key = jax.random.PRNGKey(0)
    k_x, k_c, k_x2 = jax.random.split(key, 3)

    # Small shapes consistent with the module: N samples, D features, K micro-clusters.
    N, D, K = 16, 8, 4
    x = jax.random.normal(k_x, (N, D), dtype=jnp.float32)
    centers = jax.random.normal(k_c, (K, D), dtype=jnp.float32) * 2.0

    assignments = jax.block_until_ready(cluster_net_forward(x, centers))
    ref = _reference_forward(x, centers)
    assert assignments.shape == (N,)
    assert assignments.dtype == jnp.int32
    assert bool(jnp.all(assignments == ref)), (assignments, ref)

    # Exercise the multi-tile + partial-tile (padding) path with a small tile.
    N2 = 700
    x2 = jax.random.normal(k_x2, (N2, D), dtype=jnp.float32)
    assignments2 = jax.block_until_ready(cluster_net_forward(x2, centers, tile_n=256))
    ref2 = _reference_forward(x2, centers)
    assert assignments2.shape == (N2,)
    assert bool(jnp.all(assignments2 == ref2))

    print("KERNEL_OK")
</pallas_src>

<mosaic_0001>
module attributes {stable_mosaic.version = 11 : i64} {
  func.func @_cluster_assign_kernel(%arg0: i32, %arg1: memref<4x8xf32, #tpu.memory_space<vmem>>, %arg2: memref<8x128xf32, #tpu.memory_space<vmem>>, %arg3: memref<1x128xi32, #tpu.memory_space<vmem>>) attributes {dimension_semantics = [#tpu.dimension_semantics<parallel>], iteration_bounds = array<i64: 1>, scalar_prefetch = 0 : i64, scratch_operands = 0 : i64, tpu.core_type = #tpu.core_type<tc>, window_params = [{pipeline_mode = #tpu.pipeline_mode<synchronous>, transform_indices = @transform_0, window_bounds = array<i64: 4, 8>}, {transform_indices = @transform_1, window_bounds = array<i64: 8, 128>}, {transform_indices = @transform_2, window_bounds = array<i64: 1, 128>}]} {
    %c0 = arith.constant 0 : index
    %c0_0 = arith.constant 0 : index
    %0 = vector.load %arg1[%c0, %c0_0] : memref<4x8xf32, #tpu.memory_space<vmem>>, vector<4x8xf32>
    %c0_1 = arith.constant 0 : index
    %c0_2 = arith.constant 0 : index
    %1 = vector.load %arg2[%c0_1, %c0_2] : memref<8x128xf32, #tpu.memory_space<vmem>>, vector<8x128xf32>
    %2 = arith.mulf %0, %0 : vector<4x8xf32>
    %cst = arith.constant dense<0.000000e+00> : vector<4xf32>
    %3 = vector.multi_reduction <add>, %2, %cst [1] : vector<4x8xf32> to vector<4xf32>
    %4 = vector.shape_cast %3 : vector<4xf32> to vector<4x1xf32>
    %cst_3 = arith.constant dense<0.000000e+00> : vector<4x128xf32>
    %5 = tpu.matmul %0, %1, %cst_3 {dimension_numbers = #tpu.dot_dimension_numbers<[1], [0], [0], [1], [0, 0, 1, 1], [], []>} : vector<4x8xf32>, vector<8x128xf32>, vector<4x128xf32> -> vector<4x128xf32>
    %cst_4 = arith.constant 2.000000e+00 : f32
    %6 = vector.broadcast %cst_4 : f32 to vector<4x128xf32>
    %7 = arith.mulf %6, %5 : vector<4x128xf32>
    %8 = vector.broadcast %4 : vector<4x1xf32> to vector<4x128xf32>
    %9 = arith.subf %8, %7 : vector<4x128xf32>
    %10 = vector.extract_strided_slice %9 {offsets = [0, 0], sizes = [1, 128], strides = [1, 1]} : vector<4x128xf32> to vector<1x128xf32>
    %c0_i32 = arith.constant 0 : i32
    %11 = vector.broadcast %c0_i32 : i32 to vector<1x128xi32>
    %12 = vector.extract_strided_slice %9 {offsets = [1, 0], sizes = [1, 128], strides = [1, 1]} : vector<4x128xf32> to vector<1x128xf32>
    %13 = arith.cmpf olt, %12, %10 : vector<1x128xf32>
    %14 = arith.select %13, %12, %10 : vector<1x128xi1>, vector<1x128xf32>
    %c1_i32 = arith.constant 1 : i32
    %15 = vector.broadcast %c1_i32 : i32 to vector<1x128xi32>
    %16 = arith.select %13, %15, %11 : vector<1x128xi1>, vector<1x128xi32>
    %17 = vector.extract_strided_slice %9 {offsets = [2, 0], sizes = [1, 128], strides = [1, 1]} : vector<4x128xf32> to vector<1x128xf32>
    %18 = arith.cmpf olt, %17, %14 : vector<1x128xf32>
    %19 = arith.select %18, %17, %14 : vector<1x128xi1>, vector<1x128xf32>
    %c2_i32 = arith.constant 2 : i32
    %20 = vector.broadcast %c2_i32 : i32 to vector<1x128xi32>
    %21 = arith.select %18, %20, %16 : vector<1x128xi1>, vector<1x128xi32>
    %22 = vector.extract_strided_slice %9 {offsets = [3, 0], sizes = [1, 128], strides = [1, 1]} : vector<4x128xf32> to vector<1x128xf32>
    %23 = arith.cmpf olt, %22, %19 : vector<1x128xf32>
    %c3_i32 = arith.constant 3 : i32
    %24 = vector.broadcast %c3_i32 : i32 to vector<1x128xi32>
    %25 = arith.select %23, %24, %21 : vector<1x128xi1>, vector<1x128xi32>
    %c0_5 = arith.constant 0 : index
    %c0_6 = arith.constant 0 : index
    %26 = vector.load %arg3[%c0_5, %c0_6] : memref<1x128xi32, #tpu.memory_space<vmem>>, vector<1x128xi32>
    tpu.vector_store %arg3[%c0_5, %c0_6], %25 {strides = array<i32>} : memref<1x128xi32, #tpu.memory_space<vmem>>, vector<1x128xi32>,
    return
  }
  func.func @transform_0(%arg0: i32) -> (i32, i32) {
    %c0_i32 = arith.constant 0 : i32
    %c0_i32_0 = arith.constant 0 : i32
    %c0_i32_1 = arith.constant 0 : i32
    return %c0_i32, %c0_i32_0 : i32, i32
  }
  func.func @transform_1(%arg0: i32) -> (i32, i32) {
    %c0_i32 = arith.constant 0 : i32
    %c0_i32_0 = arith.constant 0 : i32
    return %c0_i32, %arg0 : i32, i32
  }
  func.func @transform_2(%arg0: i32) -> (i32, i32) {
    %c0_i32 = arith.constant 0 : i32
    %c0_i32_0 = arith.constant 0 : i32
    return %c0_i32, %arg0 : i32, i32
  }
}

</mosaic_0001>

<bundles_post_ra>
// kernel: tpu_custom_call.1
= control target key start
LH: loop header
LB: loop body
LE: loop exit
PB: predicated region body
PF: predicated region fallthrough
CT: control target
= control target key end

     0   :  { %7 = vsyncpa [#allocation3], 0  ;;  %s298_s0 = inlined_call_operand.hbm [shape: f32[4,8], index: 0, kind: input, shape index: {}]   ;;  %s299_s1 = inlined_call_operand.hbm [shape: f32[8,128], index: 1, kind: input, shape index: {}]   ;;  %s300_s2 = inlined_call_operand.hbm [shape: s32[1,128], index: 2, kind: output, shape index: {}]  }
   0x1   :  { %8 = vsyncpa [#allocation6], 0 }
   0x2   :  { %9 = vsyncpa [#allocation4], 0  ;;  %s241_s9 = smov [#allocation2]   ;;  %s242_s11 = smov [#allocation5]  }
   0x3   :  { %s16_s10 = sshll.u32 %s241_s9, 4  ;;  %s26_s12 = sshll.u32 %s242_s11, 4  ;;  %s17_s10 = int_to_ptr.vmem [resolvable:$true] %s16_s10  ;;  %s27_s12 = int_to_ptr.vmem [resolvable:$true] %s26_s12 }
   0x4   :  { %s169_s15 = scalar_lea.hbm %s298_s0, 64 }
   0x5   :  { %p170_p0 = scmp.ne.s32.totalorder %s298_s0, %s169_s15  ;;  %p173_p1 = scmp.lt.u32.totalorder %s169_s15, %s298_s0 }
   0x7   :  { %p175_p2 = pnand %p173_p1, %p170_p0 }
   0x9   :  { %178 = shalt.err (!%p175_p2)
}
   0xa   :  { %s179_s20 = scalar_lea.vmem %s17_s10, 64  ;;  %p184_p4 = scmp.lt.s32.totalorder %s17_s10, %s17_s10 }
   0xb   :  { %p180_p3 = scmp.ne.s32.totalorder %s17_s10, %s179_s20  ;;  %p185_p5 = scmp.lt.s32.totalorder %s179_s20, %s179_s20 }
   0xd   :  { %p186_p6 = por %p185_p5, %p184_p4 }
   0xf   :  { %p187_p7 = pnand %p186_p6, %p180_p3 }
  0x11   :  { %190 = shalt.err (!%p187_p7)
}
  0x12   :  { %19 = dma.hbm_to_vmem [thread:$0]  %s298_s0, 64, %s17_s10, [#allocation3]  }
  0x13   :  { %s191_s25 = scalar_lea.hbm %s299_s1, 128 }
  0x14   :  { %p192_p8 = scmp.ne.s32.totalorder %s299_s1, %s191_s25  ;;  %p195_p9 = scmp.lt.u32.totalorder %s191_s25, %s299_s1 }
  0x16   :  { %p197_p10 = pnand %p195_p9, %p192_p8 }
  0x18   :  { %200 = shalt.err (!%p197_p10)
}
  0x19   :  { %s201_s30 = scalar_lea.vmem %s27_s12, 128  ;;  %p206_p12 = scmp.lt.s32.totalorder %s27_s12, %s27_s12 }
  0x1a   :  { %p202_p11 = scmp.ne.s32.totalorder %s27_s12, %s201_s30  ;;  %p207_p13 = scmp.lt.s32.totalorder %s201_s30, %s201_s30 }
  0x1c   :  { %p208_p0 = por %p207_p13, %p206_p12 }
  0x1e   :  { %p209_p1 = pnand %p208_p0, %p202_p11 }
  0x20   :  { %212 = shalt.err (!%p209_p1)
}
  0x21   :  { %29 = dma.hbm_to_vmem [thread:$0]  %s299_s1, 128, %s27_s12, [#allocation6]  }
  0x22   :  { %235 = dma.done.wait [#allocation3], 64  }
  0x23   :  { %236 = vsyncadd [#allocation3], 4294967232 }
  0x24   :  { %237 = dma.done.wait [#allocation6], 128  }
  0x25   :  { %238 = vsyncadd [#allocation6], 4294967168  ;;  %v243_v0 = vmov 0.0   ;;  %vm244_vm0 = vmmov 0   ;;  %vm43_vm1 = vcmask 64512   ;;  %v37_v1 = vld [vmem:[#allocation5] sm:$0xff] }
  0x26   :  { %158 = vmatprep.subr.mxu0 %v243_v0  ;;  %160 = vmatprep.mubr.msk.f32.mxu0 %vm244_vm0, %v243_v0  ;;  %v36_v2 = vld [vmem:[#allocation2] sm:$0xf]  ;;  %vm39_vm2 = vcmask 60416   ;;  %v245_v12 = vmov 0   ;;  %s246_s1 = smov [#allocation7]  }
  0x27   :  { %159 = vmatpush3.msra.mxu0 %v37_v1  ;;  %v38_v3 = vmul.f32 %v36_v2, %v36_v2  ;;  %s145_s4 = sshll.u32 %s246_s1, 4  ;;  %s146_s4 = int_to_ptr.vmem [resolvable:$true] %s145_s4 }
  0x28   :  { %161 = vmatmul.mubr.msk.f32.vlgmr.msra.gmra.mrb[0].mxu0 %vm43_vm1, %v36_v2  ;;  %s213_s5 = scalar_lea.vmem %s146_s4, 16  ;;  %s217_s6 = scalar_lea.vmem %s146_s4, 32 }
  0x29   :  { %v40_v4 = vsel %vm39_vm2, %v38_v3, 0.0  ;;  %p214_p2 = scmp.ne.s32.totalorder %s146_s4, %s213_s5  ;;  %p218_p3 = scmp.lt.s32.totalorder %s146_s4, %s146_s4 }
  0x2a   :  { %41 = vadd.xlane.f32.xlu0 %v40_v4  ;;  %p219_p4 = scmp.lt.s32.totalorder %s217_s6, %s213_s5 }
  0x2c   :  { %p220_p5 = por %p219_p4, %p218_p3 }
  0x2e   :  { %p221_p6 = pnand %p220_p5, %p214_p2 }
  0xb7   :  { %v42_v6 = vpop.xlane.xlu0 %41 }
  0xfb   :  { %v113_v5 = vpop.f32.mrb[0].mxu0 }
  0xfc   :  { %v117_v7 = vmul.f32 2.0, %v113_v5  ;;  %v162_v8 = vpop.f32.mrb[1].mxu0 }
  0xfe   :  { %v118_v9 = vsub.f32 %v42_v6, %v117_v7 }
 0x100   :  { %v120_v10 = vrot.slane %v118_v9, 7 }
 0x102   :  { %vm122_vm3 = vcmp.lt.f32.partialorder %v118_v9, %v120_v10 }
 0x103   :  { %v123_v11 = vsel %vm122_vm3, %v118_v9, %v120_v10  ;;  %v124_v13 = vsel %vm122_vm3, 1, %v245_v12 }
 0x104   :  { %v126_v14 = vrot.slane %v123_v11, 7  ;;  %v130_v15 = vrot.slane %v124_v13, 7 }
 0x106   :  { %vm128_vm4 = vcmp.lt.f32.partialorder %v118_v9, %v126_v14 }
 0x107   :  { %v129_v16 = vsel %vm128_vm4, %v118_v9, %v126_v14  ;;  %v131_v17 = vsel %vm128_vm4, 2, %v130_v15 }
 0x108   :  { %v133_v18 = vrot.slane %v129_v16, 7  ;;  %v136_v19 = vrot.slane %v131_v17, 7 }
 0x10a   :  { %vm135_vm5 = vcmp.lt.f32.partialorder %v118_v9, %v133_v18 }
 0x10b   :  { %v137_v20 = vsel %vm135_vm5, 3, %v136_v19 }
 0x10c   :  { %138 = vst [vmem:[#allocation7 - $0x3] sm:$0x8] %v137_v20 }
 0x10d   :  { %224 = shalt.err (!%p221_p6)
}
 0x10e   :  { %s225_s9 = scalar_lea.hbm %s300_s2, 16 }
 0x10f   :  { %p226_p7 = scmp.ne.s32.totalorder %s300_s2, %s225_s9  ;;  %p229_p8 = scmp.lt.u32.totalorder %s225_s9, %s300_s2 }
 0x111   :  { %p231_p9 = pnand %p229_p8, %p226_p7 }
 0x113   :  { %234 = shalt.err (!%p231_p9)
}
 0x114   :  { %148 = dma.vmem_to_hbm [thread:$0]  %s146_s4, 16, %s300_s2, [#allocation4]  }
 0x115   :  { %239 = dma.done.wait [#allocation4], 16  }
 0x116   :  { %240 = vsyncadd [#allocation4], 4294967280 }
 0x117   :  { %152 = vsyncpa [#allocation3], 1 }
 0x118   :  { %153 = vsyncpa [#allocation6], 1 }
 0x119   :  { %154 = vsyncpa [#allocation4], 1 }

</bundles_post_ra>
